<compile_context>
chip_gen: v7x
topology: tpu7x:2x2x1
jax: 0.10.0
libtpu: 0.0.40
codegen_flags: <defaults>
</compile_context>

<pallas_src>
import functools

import jax
import jax.numpy as jnp
from jax.experimental import pallas as pl
from jax.experimental.pallas import tpu as pltpu

EPS = 1e-5
LANE = 128
D_IN = 512


def _round_up(n, m):
    return (n + m - 1) // m * m


# --------------------------------------------------------------------------
# Stage 1: h1 = x @ W1  (bf16 MXU, f32 accum); accumulate batch sum / sumsq.
# --------------------------------------------------------------------------
def _stage1_kernel(b_valid, x_ref, w1_ref, h1_ref, s_ref, ss_ref):
    i = pl.program_id(0)

    h = jnp.dot(x_ref[...], w1_ref[...], preferred_element_type=jnp.float32)
    h1_ref[...] = h

    tb = h.shape[0]
    rows = jax.lax.broadcasted_iota(jnp.int32, h.shape, 0) + i * tb
    hm = jnp.where(rows < b_valid, h, 0.0)   # mask batch-padding rows out of stats

    @pl.when(i == 0)
    def _():
        s_ref[...] = jnp.zeros_like(s_ref)
        ss_ref[...] = jnp.zeros_like(ss_ref)

    s_ref[...] += jnp.sum(hm, axis=0, keepdims=True)
    ss_ref[...] += jnp.sum(hm * hm, axis=0, keepdims=True)


# --------------------------------------------------------------------------
# Stage 2: BN1(h1) + ReLU -> h2 = hn @ W2; accumulate batch sum / sumsq of h2.
# --------------------------------------------------------------------------
def _stage2_kernel(b_valid, inv_b, h1_ref, s1_ref, ss1_ref, g1_ref, be1_ref,
                   w2_ref, h2_ref, s_ref, ss_ref):
    i = pl.program_id(0)

    mean = s1_ref[...] * inv_b
    var = jnp.maximum(ss1_ref[...] * inv_b - mean * mean, 0.0)
    scale = g1_ref[...] * jax.lax.rsqrt(var + EPS)
    shift = be1_ref[...] - mean * scale

    hn = jnp.maximum(h1_ref[...] * scale + shift, 0.0)        # folded BN + ReLU (f32)
    h = jnp.dot(hn.astype(jnp.bfloat16), w2_ref[...],
                preferred_element_type=jnp.float32)
    h2_ref[...] = h

    tb = h.shape[0]
    rows = jax.lax.broadcasted_iota(jnp.int32, h.shape, 0) + i * tb
    hm = jnp.where(rows < b_valid, h, 0.0)

    @pl.when(i == 0)
    def _():
        s_ref[...] = jnp.zeros_like(s_ref)
        ss_ref[...] = jnp.zeros_like(ss_ref)

    s_ref[...] += jnp.sum(hm, axis=0, keepdims=True)
    ss_ref[...] += jnp.sum(hm * hm, axis=0, keepdims=True)


# --------------------------------------------------------------------------
# Stage 3: BN2(h2) + ReLU -> out = hn @ W3 + b3.
# --------------------------------------------------------------------------
def _stage3_kernel(inv_b, h2_ref, s2_ref, ss2_ref, g2_ref, be2_ref,
                   w3_ref, b3_ref, out_ref):
    mean = s2_ref[...] * inv_b
    var = jnp.maximum(ss2_ref[...] * inv_b - mean * mean, 0.0)
    scale = g2_ref[...] * jax.lax.rsqrt(var + EPS)
    shift = be2_ref[...] - mean * scale

    hn = jnp.maximum(h2_ref[...] * scale + shift, 0.0)
    out_ref[...] = (jnp.dot(hn.astype(jnp.bfloat16), w3_ref[...],
                            preferred_element_type=jnp.float32)
                    + b3_ref[...])


# --------------------------------------------------------------------------
# Wrapper
# --------------------------------------------------------------------------
def _label_predictor_impl(x, kp, *, digit_classes):
    B, d_in = x.shape
    assert d_in == D_IN

    # Batch tile: multiple of 16 (bf16 sublane packing), capped at 512 rows.
    TB = 512 if B > 512 else _round_up(B, 16)
    Bp = _round_up(B, TB)
    ntiles = Bp // TB
    inv_b = 1.0 / float(B)

    xb = jnp.zeros((Bp, d_in), jnp.bfloat16).at[:B].set(x.astype(jnp.bfloat16))

    f32 = jnp.float32
    vec = pl.BlockSpec((1, LANE), lambda i: (0, 0))           # stats / BN params / bias
    w512 = pl.BlockSpec((D_IN, LANE), lambda i: (0, 0))       # resident weight
    w128 = pl.BlockSpec((LANE, LANE), lambda i: (0, 0))       # resident weight
    xblk = pl.BlockSpec((TB, D_IN), lambda i: (i, 0))
    hblk = pl.BlockSpec((TB, LANE), lambda i: (i, 0))

    # ---- Stage 1: x @ W1 + stats ------------------------------------------
    h1, s1, ss1 = pl.pallas_call(
        functools.partial(_stage1_kernel, B),
        grid=(ntiles,),
        in_specs=[xblk, w512],
        out_specs=(hblk, vec, vec),
        out_shape=(jax.ShapeDtypeStruct((Bp, LANE), f32),
                   jax.ShapeDtypeStruct((1, LANE), f32),
                   jax.ShapeDtypeStruct((1, LANE), f32)),
        compiler_params=pltpu.CompilerParams(dimension_semantics=("arbitrary",)),
        cost_estimate=pl.CostEstimate(
            flops=2 * Bp * D_IN * LANE, transcendentals=0,
            bytes_accessed=Bp * D_IN * 2 + D_IN * LANE * 2 + Bp * LANE * 4),
    )(xb, kp["w1"])

    # ---- Stage 2: BN1 + ReLU + @ W2 + stats ---------------------------------
    h2, s2, ss2 = pl.pallas_call(
        functools.partial(_stage2_kernel, B, inv_b),
        grid=(ntiles,),
        in_specs=[hblk, vec, vec, vec, vec, w128],
        out_specs=(hblk, vec, vec),
        out_shape=(jax.ShapeDtypeStruct((Bp, LANE), f32),
                   jax.ShapeDtypeStruct((1, LANE), f32),
                   jax.ShapeDtypeStruct((1, LANE), f32)),
        compiler_params=pltpu.CompilerParams(dimension_semantics=("arbitrary",)),
        cost_estimate=pl.CostEstimate(
            flops=2 * Bp * LANE * LANE + 6 * Bp * LANE, transcendentals=LANE,
            bytes_accessed=2 * Bp * LANE * 4 + LANE * LANE * 2),
    )(h1, s1, ss1, kp["g1"], kp["be1"], kp["w2"])

    # ---- Stage 3: BN2 + ReLU + @ W3 + b3 ------------------------------------
    out_p = pl.pallas_call(
        functools.partial(_stage3_kernel, inv_b),
        grid=(ntiles,),
        in_specs=[hblk, vec, vec, vec, vec, w128, vec],
        out_specs=hblk,
        out_shape=jax.ShapeDtypeStruct((Bp, LANE), f32),
        compiler_params=pltpu.CompilerParams(dimension_semantics=("parallel",)),
        cost_estimate=pl.CostEstimate(
            flops=2 * Bp * LANE * LANE + 6 * Bp * LANE, transcendentals=LANE,
            bytes_accessed=2 * Bp * LANE * 4 + LANE * LANE * 2),
    )(h2, s2, ss2, kp["g2"], kp["be2"], kp["w3"], kp["b3"])

    return out_p[:B, :digit_classes]


label_predictor = jax.jit(_label_predictor_impl, static_argnames=("digit_classes",))


# --------------------------------------------------------------------------
# Parameters
# --------------------------------------------------------------------------
def init_params(key, digit_classes=10):
    """Logical (PyTorch-shaped, f32) parameters."""
    ks = jax.random.split(key, 6)

    def lin(kw, kb, fan_in, fan_out):
        bound = 1.0 / jnp.sqrt(float(fan_in))
        w = jax.random.uniform(kw, (fan_in, fan_out), jnp.float32, -bound, bound)
        b = jax.random.uniform(kb, (1, fan_out), jnp.float32, -bound, bound)
        return w, b

    w1, b1 = lin(ks[0], ks[1], 512, 100)
    w2, b2 = lin(ks[2], ks[3], 100, 100)
    w3, b3 = lin(ks[4], ks[5], 100, digit_classes)
    ones = jnp.ones((1, 100), jnp.float32)
    zeros = jnp.zeros((1, 100), jnp.float32)
    return dict(w1=w1, b1=b1, g1=ones, be1=zeros,
                w2=w2, b2=b2, g2=ones, be2=zeros,
                w3=w3, b3=b3)


def prepare_kernel_params(p):
    """Lane-pad to 128 and cast weights to bf16 for the kernel (do this once)."""
    def pad2(a, r, c):
        out = jnp.zeros((r, c), jnp.float32)
        return out.at[:a.shape[0], :a.shape[1]].set(a)

    return dict(
        w1=pad2(p["w1"], D_IN, LANE).astype(jnp.bfloat16),
        w2=pad2(p["w2"], LANE, LANE).astype(jnp.bfloat16),
        w3=pad2(p["w3"], LANE, LANE).astype(jnp.bfloat16),
        # gamma/beta padded with ZEROS so padded lanes stay exactly 0 through BN+ReLU.
        g1=pad2(p["g1"], 1, LANE), be1=pad2(p["be1"], 1, LANE),
        g2=pad2(p["g2"], 1, LANE), be2=pad2(p["be2"], 1, LANE),
        b3=pad2(p["b3"], 1, LANE),
        # b1, b2 intentionally dropped: BatchNorm's mean subtraction cancels them.
    )


# --------------------------------------------------------------------------
# Pure-JAX reference (faithful module semantics, f32, with biases)
# --------------------------------------------------------------------------
def label_predictor_ref(x, p):
    def bn_relu(h, g, b):
        m = jnp.mean(h, axis=0, keepdims=True)
        v = jnp.mean((h - m) ** 2, axis=0, keepdims=True)
        return jnp.maximum((h - m) * jax.lax.rsqrt(v + EPS) * g + b, 0.0)

    h = bn_relu(x @ p["w1"] + p["b1"], p["g1"], p["be1"])
    h = bn_relu(h @ p["w2"] + p["b2"], p["g2"], p["be2"])
    return h @ p["w3"] + p["b3"]


if __name__ == "__main__":
    key = jax.random.PRNGKey(0)
    k_x, k_p = jax.random.split(key)

    B, N_CLASSES = 8, 10
    x = jax.random.normal(k_x, (B, D_IN), jnp.float32)
    params = init_params(k_p, digit_classes=N_CLASSES)
    kparams = prepare_kernel_params(params)

    out = jax.block_until_ready(label_predictor(x, kparams, digit_classes=N_CLASSES))
    ref = label_predictor_ref(x, params)

    assert out.shape == (B, N_CLASSES), out.shape
    assert bool(jnp.all(jnp.isfinite(out))), "non-finite output"
    # bf16 matmuls vs f32 reference -> loose but meaningful tolerance.
    assert jnp.allclose(out, ref, atol=1e-1, rtol=1e-1), "mismatch vs pure-JAX reference"
    print("KERNEL_OK")
</pallas_src>

<mosaic_0001>
module attributes {stable_mosaic.version = 11 : i64} {
  func.func @_stage1_kernel(%arg0: i32, %arg1: memref<16x512xbf16, #tpu.memory_space<vmem>>, %arg2: memref<512x128xbf16, #tpu.memory_space<vmem>>, %arg3: memref<16x128xf32, #tpu.memory_space<vmem>>, %arg4: memref<1x128xf32, #tpu.memory_space<vmem>>, %arg5: memref<1x128xf32, #tpu.memory_space<vmem>>) attributes {dimension_semantics = [#tpu.dimension_semantics<arbitrary>], iteration_bounds = array<i64: 1>, scalar_prefetch = 0 : i64, scratch_operands = 0 : i64, tpu.core_type = #tpu.core_type<tc>, window_params = [{transform_indices = @transform_0, window_bounds = array<i64: 16, 512>}, {pipeline_mode = #tpu.pipeline_mode<synchronous>, transform_indices = @transform_1, window_bounds = array<i64: 512, 128>}, {transform_indices = @transform_2, window_bounds = array<i64: 16, 128>}, {pipeline_mode = #tpu.pipeline_mode<synchronous>, transform_indices = @transform_3, window_bounds = array<i64: 1, 128>}, {pipeline_mode = #tpu.pipeline_mode<synchronous>, transform_indices = @transform_4, window_bounds = array<i64: 1, 128>}]} {
    %c0 = arith.constant 0 : index
    %c0_0 = arith.constant 0 : index
    %0 = vector.load %arg1[%c0, %c0_0] : memref<16x512xbf16, #tpu.memory_space<vmem>>, vector<16x512xbf16>
    %c0_1 = arith.constant 0 : index
    %c0_2 = arith.constant 0 : index
    %1 = vector.load %arg2[%c0_1, %c0_2] : memref<512x128xbf16, #tpu.memory_space<vmem>>, vector<512x128xbf16>
    %cst = arith.constant dense<0.000000e+00> : vector<16x128xf32>
    %2 = tpu.matmul %0, %1, %cst {dimension_numbers = #tpu.dot_dimension_numbers<[1], [0], [0], [1], [0, 0, 1, 1], [], []>} : vector<16x512xbf16>, vector<512x128xbf16>, vector<16x128xf32> -> vector<16x128xf32>
    %c0_3 = arith.constant 0 : index
    %c0_4 = arith.constant 0 : index
    %3 = vector.load %arg3[%c0_3, %c0_4] : memref<16x128xf32, #tpu.memory_space<vmem>>, vector<16x128xf32>
    tpu.vector_store %arg3[%c0_3, %c0_4], %2 {strides = array<i32>} : memref<16x128xf32, #tpu.memory_space<vmem>>, vector<16x128xf32>,
    %4 = tpu.iota {dimensions = array<i32: 0>} : vector<16x128xi32>
    %c16_i32 = arith.constant 16 : i32
    %5 = arith.muli %arg0, %c16_i32 : i32
    %6 = vector.broadcast %5 : i32 to vector<16x128xi32>
    %7 = arith.addi %4, %6 : vector<16x128xi32>
    %c8_i32 = arith.constant 8 : i32
    %8 = vector.broadcast %c8_i32 : i32 to vector<16x128xi32>
    %9 = arith.cmpi slt, %7, %8 : vector<16x128xi32>
    %cst_5 = arith.constant 0.000000e+00 : f32
    %10 = vector.broadcast %cst_5 : f32 to vector<16x128xf32>
    %11 = arith.select %9, %2, %10 : vector<16x128xi1>, vector<16x128xf32>
    %c0_i32 = arith.constant 0 : i32
    %12 = arith.cmpi eq, %arg0, %c0_i32 : i32
    %13 = arith.extui %12 : i1 to i32
    %c0_i32_6 = arith.constant 0 : i32
    %14 = arith.cmpi ne, %13, %c0_i32_6 : i32
    scf.if %14 {
      %cst_17 = arith.constant 0.000000e+00 : f32
      %26 = vector.broadcast %cst_17 : f32 to vector<1x128xf32>
      %c0_18 = arith.constant 0 : index
      %c0_19 = arith.constant 0 : index
      %27 = vector.load %arg4[%c0_18, %c0_19] : memref<1x128xf32, #tpu.memory_space<vmem>>, vector<1x128xf32>
      tpu.vector_store %arg4[%c0_18, %c0_19], %26 {strides = array<i32>} : memref<1x128xf32, #tpu.memory_space<vmem>>, vector<1x128xf32>,
      %cst_20 = arith.constant 0.000000e+00 : f32
      %28 = vector.broadcast %cst_20 : f32 to vector<1x128xf32>
      %c0_21 = arith.constant 0 : index
      %c0_22 = arith.constant 0 : index
      %29 = vector.load %arg5[%c0_21, %c0_22] : memref<1x128xf32, #tpu.memory_space<vmem>>, vector<1x128xf32>
      tpu.vector_store %arg5[%c0_21, %c0_22], %28 {strides = array<i32>} : memref<1x128xf32, #tpu.memory_space<vmem>>, vector<1x128xf32>,
    } else {
    }
    %c0_7 = arith.constant 0 : index
    %c0_8 = arith.constant 0 : index
    %15 = vector.load %arg4[%c0_7, %c0_8] : memref<1x128xf32, #tpu.memory_space<vmem>>, vector<1x128xf32>
    %cst_9 = arith.constant dense<0.000000e+00> : vector<128xf32>
    %16 = vector.multi_reduction <add>, %11, %cst_9 [0] : vector<16x128xf32> to vector<128xf32>
    %17 = vector.shape_cast %16 : vector<128xf32> to vector<1x128xf32>
    %18 = arith.addf %15, %17 : vector<1x128xf32>
    %c0_10 = arith.constant 0 : index
    %c0_11 = arith.constant 0 : index
    %19 = vector.load %arg4[%c0_10, %c0_11] : memref<1x128xf32, #tpu.memory_space<vmem>>, vector<1x128xf32>
    tpu.vector_store %arg4[%c0_10, %c0_11], %18 {strides = array<i32>} : memref<1x128xf32, #tpu.memory_space<vmem>>, vector<1x128xf32>,
    %c0_12 = arith.constant 0 : index
    %c0_13 = arith.constant 0 : index
    %20 = vector.load %arg5[%c0_12, %c0_13] : memref<1x128xf32, #tpu.memory_space<vmem>>, vector<1x128xf32>
    %21 = arith.mulf %11, %11 : vector<16x128xf32>
    %cst_14 = arith.constant dense<0.000000e+00> : vector<128xf32>
    %22 = vector.multi_reduction <add>, %21, %cst_14 [0] : vector<16x128xf32> to vector<128xf32>
    %23 = vector.shape_cast %22 : vector<128xf32> to vector<1x128xf32>
    %24 = arith.addf %20, %23 : vector<1x128xf32>
    %c0_15 = arith.constant 0 : index
    %c0_16 = arith.constant 0 : index
    %25 = vector.load %arg5[%c0_15, %c0_16] : memref<1x128xf32, #tpu.memory_space<vmem>>, vector<1x128xf32>
    tpu.vector_store %arg5[%c0_15, %c0_16], %24 {strides = array<i32>} : memref<1x128xf32, #tpu.memory_space<vmem>>, vector<1x128xf32>,
    return
  }
  func.func @transform_0(%arg0: i32) -> (i32, i32) {
    %c0_i32 = arith.constant 0 : i32
    %c0_i32_0 = arith.constant 0 : i32
    return %arg0, %c0_i32 : i32, i32
  }
  func.func @transform_1(%arg0: i32) -> (i32, i32) {
    %c0_i32 = arith.constant 0 : i32
    %c0_i32_0 = arith.constant 0 : i32
    %c0_i32_1 = arith.constant 0 : i32
    return %c0_i32, %c0_i32_0 : i32, i32
  }
  func.func @transform_2(%arg0: i32) -> (i32, i32) {
    %c0_i32 = arith.constant 0 : i32
    %c0_i32_0 = arith.constant 0 : i32
    return %arg0, %c0_i32 : i32, i32
  }
  func.func @transform_3(%arg0: i32) -> (i32, i32) {
    %c0_i32 = arith.constant 0 : i32
    %c0_i32_0 = arith.constant 0 : i32
    %c0_i32_1 = arith.constant 0 : i32
    return %c0_i32, %c0_i32_0 : i32, i32
  }
  func.func @transform_4(%arg0: i32) -> (i32, i32) {
    %c0_i32 = arith.constant 0 : i32
    %c0_i32_0 = arith.constant 0 : i32
    %c0_i32_1 = arith.constant 0 : i32
    return %c0_i32, %c0_i32_0 : i32, i32
  }
}

module attributes {stable_mosaic.version = 11 : i64} {
  func.func @_stage2_kernel(%arg0: i32, %arg1: memref<16x128xf32, #tpu.memory_space<vmem>>, %arg2: memref<1x128xf32, #tpu.memory_space<vmem>>, %arg3: memref<1x128xf32, #tpu.memory_space<vmem>>, %arg4: memref<1x128xf32, #tpu.memory_space<vmem>>, %arg5: memref<1x128xf32, #tpu.memory_space<vmem>>, %arg6: memref<128x128xbf16, #tpu.memory_space<vmem>>, %arg7: memref<16x128xf32, #tpu.memory_space<vmem>>, %arg8: memref<1x128xf32, #tpu.memory_space<vmem>>, %arg9: memref<1x128xf32, #tpu.memory_space<vmem>>) attributes {dimension_semantics = [#tpu.dimension_semantics<arbitrary>], iteration_bounds = array<i64: 1>, scalar_prefetch = 0 : i64, scratch_operands = 0 : i64, tpu.core_type = #tpu.core_type<tc>, window_params = [{transform_indices = @transform_0, window_bounds = array<i64: 16, 128>}, {pipeline_mode = #tpu.pipeline_mode<synchronous>, transform_indices = @transform_1, window_bounds = array<i64: 1, 128>}, {pipeline_mode = #tpu.pipeline_mode<synchronous>, transform_indices = @transform_2, window_bounds = array<i64: 1, 128>}, {pipeline_mode = #tpu.pipeline_mode<synchronous>, transform_indices = @transform_3, window_bounds = array<i64: 1, 128>}, {pipeline_mode = #tpu.pipeline_mode<synchronous>, transform_indices = @transform_4, window_bounds = array<i64: 1, 128>}, {pipeline_mode = #tpu.pipeline_mode<synchronous>, transform_indices = @transform_5, window_bounds = array<i64: 128, 128>}, {transform_indices = @transform_6, window_bounds = array<i64: 16, 128>}, {pipeline_mode = #tpu.pipeline_mode<synchronous>, transform_indices = @transform_7, window_bounds = array<i64: 1, 128>}, {pipeline_mode = #tpu.pipeline_mode<synchronous>, transform_indices = @transform_8, window_bounds = array<i64: 1, 128>}]} {
    %c0 = arith.constant 0 : index
    %c0_0 = arith.constant 0 : index
    %0 = vector.load %arg2[%c0, %c0_0] : memref<1x128xf32, #tpu.memory_space<vmem>>, vector<1x128xf32>
    %cst = arith.constant 1.250000e-01 : f32
    %1 = vector.broadcast %cst : f32 to vector<1x128xf32>
    %2 = arith.mulf %0, %1 : vector<1x128xf32>
    %c0_1 = arith.constant 0 : index
    %c0_2 = arith.constant 0 : index
    %3 = vector.load %arg3[%c0_1, %c0_2] : memref<1x128xf32, #tpu.memory_space<vmem>>, vector<1x128xf32>
    %cst_3 = arith.constant 1.250000e-01 : f32
    %4 = vector.broadcast %cst_3 : f32 to vector<1x128xf32>
    %5 = arith.mulf %3, %4 : vector<1x128xf32>
    %6 = arith.mulf %2, %2 : vector<1x128xf32>
    %7 = arith.subf %5, %6 : vector<1x128xf32>
    %cst_4 = arith.constant 0.000000e+00 : f32
    %8 = vector.broadcast %cst_4 : f32 to vector<1x128xf32>
    %9 = arith.maximumf %7, %8 : vector<1x128xf32>
    %c0_5 = arith.constant 0 : index
    %c0_6 = arith.constant 0 : index
    %10 = vector.load %arg4[%c0_5, %c0_6] : memref<1x128xf32, #tpu.memory_space<vmem>>, vector<1x128xf32>
    %cst_7 = arith.constant 9.99999974E-6 : f32
    %11 = vector.broadcast %cst_7 : f32 to vector<1x128xf32>
    %12 = arith.addf %9, %11 : vector<1x128xf32>
    %13 = math.rsqrt %12 : vector<1x128xf32>
    %14 = arith.mulf %10, %13 : vector<1x128xf32>
    %c0_8 = arith.constant 0 : index
    %c0_9 = arith.constant 0 : index
    %15 = vector.load %arg5[%c0_8, %c0_9] : memref<1x128xf32, #tpu.memory_space<vmem>>, vector<1x128xf32>
    %16 = arith.mulf %2, %14 : vector<1x128xf32>
    %17 = arith.subf %15, %16 : vector<1x128xf32>
    %c0_10 = arith.constant 0 : index
    %c0_11 = arith.constant 0 : index
    %18 = vector.load %arg1[%c0_10, %c0_11] : memref<16x128xf32, #tpu.memory_space<vmem>>, vector<16x128xf32>
    %19 = vector.broadcast %14 : vector<1x128xf32> to vector<16x128xf32>
    %20 = arith.mulf %18, %19 : vector<16x128xf32>
    %21 = vector.broadcast %17 : vector<1x128xf32> to vector<16x128xf32>
    %22 = arith.addf %20, %21 : vector<16x128xf32>
    %cst_12 = arith.constant 0.000000e+00 : f32
    %23 = vector.broadcast %cst_12 : f32 to vector<16x128xf32>
    %24 = arith.maximumf %22, %23 : vector<16x128xf32>
    %25 = arith.truncf %24 : vector<16x128xf32> to vector<16x128xbf16>
    %c0_13 = arith.constant 0 : index
    %c0_14 = arith.constant 0 : index
    %26 = vector.load %arg6[%c0_13, %c0_14] : memref<128x128xbf16, #tpu.memory_space<vmem>>, vector<128x128xbf16>
    %cst_15 = arith.constant dense<0.000000e+00> : vector<16x128xf32>
    %27 = tpu.matmul %25, %26, %cst_15 {dimension_numbers = #tpu.dot_dimension_numbers<[1], [0], [0], [1], [0, 0, 1, 1], [], []>} : vector<16x128xbf16>, vector<128x128xbf16>, vector<16x128xf32> -> vector<16x128xf32>
    %c0_16 = arith.constant 0 : index
    %c0_17 = arith.constant 0 : index
    %28 = vector.load %arg7[%c0_16, %c0_17] : memref<16x128xf32, #tpu.memory_space<vmem>>, vector<16x128xf32>
    tpu.vector_store %arg7[%c0_16, %c0_17], %27 {strides = array<i32>} : memref<16x128xf32, #tpu.memory_space<vmem>>, vector<16x128xf32>,
    %29 = tpu.iota {dimensions = array<i32: 0>} : vector<16x128xi32>
    %c16_i32 = arith.constant 16 : i32
    %30 = arith.muli %arg0, %c16_i32 : i32
    %31 = vector.broadcast %30 : i32 to vector<16x128xi32>
    %32 = arith.addi %29, %31 : vector<16x128xi32>
    %c8_i32 = arith.constant 8 : i32
    %33 = vector.broadcast %c8_i32 : i32 to vector<16x128xi32>
    %34 = arith.cmpi slt, %32, %33 : vector<16x128xi32>
    %cst_18 = arith.constant 0.000000e+00 : f32
    %35 = vector.broadcast %cst_18 : f32 to vector<16x128xf32>
    %36 = arith.select %34, %27, %35 : vector<16x128xi1>, vector<16x128xf32>
    %c0_i32 = arith.constant 0 : i32
    %37 = arith.cmpi eq, %arg0, %c0_i32 : i32
    %38 = arith.extui %37 : i1 to i32
    %c0_i32_19 = arith.constant 0 : i32
    %39 = arith.cmpi ne, %38, %c0_i32_19 : i32
    scf.if %39 {
      %cst_30 = arith.constant 0.000000e+00 : f32
      %51 = vector.broadcast %cst_30 : f32 to vector<1x128xf32>
      %c0_31 = arith.constant 0 : index
      %c0_32 = arith.constant 0 : index
      %52 = vector.load %arg8[%c0_31, %c0_32] : memref<1x128xf32, #tpu.memory_space<vmem>>, vector<1x128xf32>
      tpu.vector_store %arg8[%c0_31, %c0_32], %51 {strides = array<i32>} : memref<1x128xf32, #tpu.memory_space<vmem>>, vector<1x128xf32>,
      %cst_33 = arith.constant 0.000000e+00 : f32
      %53 = vector.broadcast %cst_33 : f32 to vector<1x128xf32>
      %c0_34 = arith.constant 0 : index
      %c0_35 = arith.constant 0 : index
      %54 = vector.load %arg9[%c0_34, %c0_35] : memref<1x128xf32, #tpu.memory_space<vmem>>, vector<1x128xf32>
      tpu.vector_store %arg9[%c0_34, %c0_35], %53 {strides = array<i32>} : memref<1x128xf32, #tpu.memory_space<vmem>>, vector<1x128xf32>,
    } else {
    }
    %c0_20 = arith.constant 0 : index
    %c0_21 = arith.constant 0 : index
    %40 = vector.load %arg8[%c0_20, %c0_21] : memref<1x128xf32, #tpu.memory_space<vmem>>, vector<1x128xf32>
    %cst_22 = arith.constant dense<0.000000e+00> : vector<128xf32>
    %41 = vector.multi_reduction <add>, %36, %cst_22 [0] : vector<16x128xf32> to vector<128xf32>
    %42 = vector.shape_cast %41 : vector<128xf32> to vector<1x128xf32>
    %43 = arith.addf %40, %42 : vector<1x128xf32>
    %c0_23 = arith.constant 0 : index
    %c0_24 = arith.constant 0 : index
    %44 = vector.load %arg8[%c0_23, %c0_24] : memref<1x128xf32, #tpu.memory_space<vmem>>, vector<1x128xf32>
    tpu.vector_store %arg8[%c0_23, %c0_24], %43 {strides = array<i32>} : memref<1x128xf32, #tpu.memory_space<vmem>>, vector<1x128xf32>,
    %c0_25 = arith.constant 0 : index
    %c0_26 = arith.constant 0 : index
    %45 = vector.load %arg9[%c0_25, %c0_26] : memref<1x128xf32, #tpu.memory_space<vmem>>, vector<1x128xf32>
    %46 = arith.mulf %36, %36 : vector<16x128xf32>
    %cst_27 = arith.constant dense<0.000000e+00> : vector<128xf32>
    %47 = vector.multi_reduction <add>, %46, %cst_27 [0] : vector<16x128xf32> to vector<128xf32>
    %48 = vector.shape_cast %47 : vector<128xf32> to vector<1x128xf32>
    %49 = arith.addf %45, %48 : vector<1x128xf32>
    %c0_28 = arith.constant 0 : index
    %c0_29 = arith.constant 0 : index
    %50 = vector.load %arg9[%c0_28, %c0_29] : memref<1x128xf32, #tpu.memory_space<vmem>>, vector<1x128xf32>
    tpu.vector_store %arg9[%c0_28, %c0_29], %49 {strides = array<i32>} : memref<1x128xf32, #tpu.memory_space<vmem>>, vector<1x128xf32>,
    return
  }
  func.func @transform_0(%arg0: i32) -> (i32, i32) {
    %c0_i32 = arith.constant 0 : i32
    %c0_i32_0 = arith.constant 0 : i32
    return %arg0, %c0_i32 : i32, i32
  }
  func.func @transform_1(%arg0: i32) -> (i32, i32) {
    %c0_i32 = arith.constant 0 : i32
    %c0_i32_0 = arith.constant 0 : i32
    %c0_i32_1 = arith.constant 0 : i32
    return %c0_i32, %c0_i32_0 : i32, i32
  }
  func.func @transform_2(%arg0: i32) -> (i32, i32) {
    %c0_i32 = arith.constant 0 : i32
    %c0_i32_0 = arith.constant 0 : i32
    %c0_i32_1 = arith.constant 0 : i32
    return %c0_i32, %c0_i32_0 : i32, i32
  }
  func.func @transform_3(%arg0: i32) -> (i32, i32) {
    %c0_i32 = arith.constant 0 : i32
    %c0_i32_0 = arith.constant 0 : i32
    %c0_i32_1 = arith.constant 0 : i32
    return %c0_i32, %c0_i32_0 : i32, i32
  }
  func.func @transform_4(%arg0: i32) -> (i32, i32) {
    %c0_i32 = arith.constant 0 : i32
    %c0_i32_0 = arith.constant 0 : i32
    %c0_i32_1 = arith.constant 0 : i32
    return %c0_i32, %c0_i32_0 : i32, i32
  }
  func.func @transform_5(%arg0: i32) -> (i32, i32) {
    %c0_i32 = arith.constant 0 : i32
    %c0_i32_0 = arith.constant 0 : i32
    %c0_i32_1 = arith.constant 0 : i32
    return %c0_i32, %c0_i32_0 : i32, i32
  }
  func.func @transform_6(%arg0: i32) -> (i32, i32) {
    %c0_i32 = arith.constant 0 : i32
    %c0_i32_0 = arith.constant 0 : i32
    return %arg0, %c0_i32 : i32, i32
  }
  func.func @transform_7(%arg0: i32) -> (i32, i32) {
    %c0_i32 = arith.constant 0 : i32
    %c0_i32_0 = arith.constant 0 : i32
    %c0_i32_1 = arith.constant 0 : i32
    return %c0_i32, %c0_i32_0 : i32, i32
  }
  func.func @transform_8(%arg0: i32) -> (i32, i32) {
    %c0_i32 = arith.constant 0 : i32
    %c0_i32_0 = arith.constant 0 : i32
    %c0_i32_1 = arith.constant 0 : i32
    return %c0_i32, %c0_i32_0 : i32, i32
  }
}

module attributes {stable_mosaic.version = 11 : i64} {
  func.func @_stage3_kernel(%arg0: i32, %arg1: memref<16x128xf32, #tpu.memory_space<vmem>>, %arg2: memref<1x128xf32, #tpu.memory_space<vmem>>, %arg3: memref<1x128xf32, #tpu.memory_space<vmem>>, %arg4: memref<1x128xf32, #tpu.memory_space<vmem>>, %arg5: memref<1x128xf32, #tpu.memory_space<vmem>>, %arg6: memref<128x128xbf16, #tpu.memory_space<vmem>>, %arg7: memref<1x128xf32, #tpu.memory_space<vmem>>, %arg8: memref<16x128xf32, #tpu.memory_space<vmem>>) attributes {dimension_semantics = [#tpu.dimension_semantics<parallel>], iteration_bounds = array<i64: 1>, scalar_prefetch = 0 : i64, scratch_operands = 0 : i64, tpu.core_type = #tpu.core_type<tc>, window_params = [{transform_indices = @transform_0, window_bounds = array<i64: 16, 128>}, {pipeline_mode = #tpu.pipeline_mode<synchronous>, transform_indices = @transform_1, window_bounds = array<i64: 1, 128>}, {pipeline_mode = #tpu.pipeline_mode<synchronous>, transform_indices = @transform_2, window_bounds = array<i64: 1, 128>}, {pipeline_mode = #tpu.pipeline_mode<synchronous>, transform_indices = @transform_3, window_bounds = array<i64: 1, 128>}, {pipeline_mode = #tpu.pipeline_mode<synchronous>, transform_indices = @transform_4, window_bounds = array<i64: 1, 128>}, {pipeline_mode = #tpu.pipeline_mode<synchronous>, transform_indices = @transform_5, window_bounds = array<i64: 128, 128>}, {pipeline_mode = #tpu.pipeline_mode<synchronous>, transform_indices = @transform_6, window_bounds = array<i64: 1, 128>}, {transform_indices = @transform_7, window_bounds = array<i64: 16, 128>}]} {
    %c0 = arith.constant 0 : index
    %c0_0 = arith.constant 0 : index
    %0 = vector.load %arg2[%c0, %c0_0] : memref<1x128xf32, #tpu.memory_space<vmem>>, vector<1x128xf32>
    %cst = arith.constant 1.250000e-01 : f32
    %1 = vector.broadcast %cst : f32 to vector<1x128xf32>
    %2 = arith.mulf %0, %1 : vector<1x128xf32>
    %c0_1 = arith.constant 0 : index
    %c0_2 = arith.constant 0 : index
    %3 = vector.load %arg3[%c0_1, %c0_2] : memref<1x128xf32, #tpu.memory_space<vmem>>, vector<1x128xf32>
    %cst_3 = arith.constant 1.250000e-01 : f32
    %4 = vector.broadcast %cst_3 : f32 to vector<1x128xf32>
    %5 = arith.mulf %3, %4 : vector<1x128xf32>
    %6 = arith.mulf %2, %2 : vector<1x128xf32>
    %7 = arith.subf %5, %6 : vector<1x128xf32>
    %cst_4 = arith.constant 0.000000e+00 : f32
    %8 = vector.broadcast %cst_4 : f32 to vector<1x128xf32>
    %9 = arith.maximumf %7, %8 : vector<1x128xf32>
    %c0_5 = arith.constant 0 : index
    %c0_6 = arith.constant 0 : index
    %10 = vector.load %arg4[%c0_5, %c0_6] : memref<1x128xf32, #tpu.memory_space<vmem>>, vector<1x128xf32>
    %cst_7 = arith.constant 9.99999974E-6 : f32
    %11 = vector.broadcast %cst_7 : f32 to vector<1x128xf32>
    %12 = arith.addf %9, %11 : vector<1x128xf32>
    %13 = math.rsqrt %12 : vector<1x128xf32>
    %14 = arith.mulf %10, %13 : vector<1x128xf32>
    %c0_8 = arith.constant 0 : index
    %c0_9 = arith.constant 0 : index
    %15 = vector.load %arg5[%c0_8, %c0_9] : memref<1x128xf32, #tpu.memory_space<vmem>>, vector<1x128xf32>
    %16 = arith.mulf %2, %14 : vector<1x128xf32>
    %17 = arith.subf %15, %16 : vector<1x128xf32>
    %c0_10 = arith.constant 0 : index
    %c0_11 = arith.constant 0 : index
    %18 = vector.load %arg1[%c0_10, %c0_11] : memref<16x128xf32, #tpu.memory_space<vmem>>, vector<16x128xf32>
    %19 = vector.broadcast %14 : vector<1x128xf32> to vector<16x128xf32>
    %20 = arith.mulf %18, %19 : vector<16x128xf32>
    %21 = vector.broadcast %17 : vector<1x128xf32> to vector<16x128xf32>
    %22 = arith.addf %20, %21 : vector<16x128xf32>
    %cst_12 = arith.constant 0.000000e+00 : f32
    %23 = vector.broadcast %cst_12 : f32 to vector<16x128xf32>
    %24 = arith.maximumf %22, %23 : vector<16x128xf32>
    %25 = arith.truncf %24 : vector<16x128xf32> to vector<16x128xbf16>
    %c0_13 = arith.constant 0 : index
    %c0_14 = arith.constant 0 : index
    %26 = vector.load %arg6[%c0_13, %c0_14] : memref<128x128xbf16, #tpu.memory_space<vmem>>, vector<128x128xbf16>
    %cst_15 = arith.constant dense<0.000000e+00> : vector<16x128xf32>
    %27 = tpu.matmul %25, %26, %cst_15 {dimension_numbers = #tpu.dot_dimension_numbers<[1], [0], [0], [1], [0, 0, 1, 1], [], []>} : vector<16x128xbf16>, vector<128x128xbf16>, vector<16x128xf32> -> vector<16x128xf32>
    %c0_16 = arith.constant 0 : index
    %c0_17 = arith.constant 0 : index
    %28 = vector.load %arg7[%c0_16, %c0_17] : memref<1x128xf32, #tpu.memory_space<vmem>>, vector<1x128xf32>
    %29 = vector.broadcast %28 : vector<1x128xf32> to vector<16x128xf32>
    %30 = arith.addf %27, %29 : vector<16x128xf32>
    %c0_18 = arith.constant 0 : index
    %c0_19 = arith.constant 0 : index
    %31 = vector.load %arg8[%c0_18, %c0_19] : memref<16x128xf32, #tpu.memory_space<vmem>>, vector<16x128xf32>
    tpu.vector_store %arg8[%c0_18, %c0_19], %30 {strides = array<i32>} : memref<16x128xf32, #tpu.memory_space<vmem>>, vector<16x128xf32>,
    return
  }
  func.func @transform_0(%arg0: i32) -> (i32, i32) {
    %c0_i32 = arith.constant 0 : i32
    %c0_i32_0 = arith.constant 0 : i32
    return %arg0, %c0_i32 : i32, i32
  }
  func.func @transform_1(%arg0: i32) -> (i32, i32) {
    %c0_i32 = arith.constant 0 : i32
    %c0_i32_0 = arith.constant 0 : i32
    %c0_i32_1 = arith.constant 0 : i32
    return %c0_i32, %c0_i32_0 : i32, i32
  }
  func.func @transform_2(%arg0: i32) -> (i32, i32) {
    %c0_i32 = arith.constant 0 : i32
    %c0_i32_0 = arith.constant 0 : i32
    %c0_i32_1 = arith.constant 0 : i32
    return %c0_i32, %c0_i32_0 : i32, i32
  }
  func.func @transform_3(%arg0: i32) -> (i32, i32) {
    %c0_i32 = arith.constant 0 : i32
    %c0_i32_0 = arith.constant 0 : i32
    %c0_i32_1 = arith.constant 0 : i32
    return %c0_i32, %c0_i32_0 : i32, i32
  }
  func.func @transform_4(%arg0: i32) -> (i32, i32) {
    %c0_i32 = arith.constant 0 : i32
    %c0_i32_0 = arith.constant 0 : i32
    %c0_i32_1 = arith.constant 0 : i32
    return %c0_i32, %c0_i32_0 : i32, i32
  }
  func.func @transform_5(%arg0: i32) -> (i32, i32) {
    %c0_i32 = arith.constant 0 : i32
    %c0_i32_0 = arith.constant 0 : i32
    %c0_i32_1 = arith.constant 0 : i32
    return %c0_i32, %c0_i32_0 : i32, i32
  }
  func.func @transform_6(%arg0: i32) -> (i32, i32) {
    %c0_i32 = arith.constant 0 : i32
    %c0_i32_0 = arith.constant 0 : i32
    %c0_i32_1 = arith.constant 0 : i32
    return %c0_i32, %c0_i32_0 : i32, i32
  }
  func.func @transform_7(%arg0: i32) -> (i32, i32) {
    %c0_i32 = arith.constant 0 : i32
    %c0_i32_0 = arith.constant 0 : i32
    return %arg0, %c0_i32 : i32, i32
  }
}

</mosaic_0001>

<bundles_post_ra>
// kernel: _label_predictor_impl.4
= control target key start
LH: loop header
LB: loop body
LE: loop exit
PB: predicated region body
PF: predicated region fallthrough
CT: control target
= control target key end

     0   :  { %v269_v0 = vmov 0.0   ;;  %vm270_vm0 = vmmov 0   ;;  %v44_v15 = vlaneseq  ;;  %s382_s5 = inlined_call_operand.vmem [shape: bf16[128,128], index: 5, kind: input, shape index: {}]   ;;  %s383_s7 = inlined_call_operand.vmem [shape: f32[1,128], index: 7, kind: output, shape index: {1}]   ;;  %s384_s8 = inlined_call_operand.vmem [shape: f32[1,128], index: 8, kind: output, shape index: {2}]   ;;  %s385_s1 = inlined_call_operand.vmem [shape: f32[1,128], index: 1, kind: input, shape index: {}]   ;;  %s386_s2 = inlined_call_operand.vmem [shape: f32[1,128], index: 2, kind: input, shape index: {}]   ;;  %s387_s3 = inlined_call_operand.vmem [shape: f32[1,128], index: 3, kind: input, shape index: {}]   ;;  %s388_s0 = inlined_call_operand.vmem [shape: f32[16,128], index: 0, kind: input, shape index: {}]   ;;  %s389_s4 = inlined_call_operand.vmem [shape: f32[1,128], index: 4, kind: input, shape index: {}]   ;;  %s390_s6 = inlined_call_operand.vmem [shape: f32[16,128], index: 6, kind: output, shape index: {0}]  }
   0x1   :  { %237 = vmatprep.subr.bf16.mxu0 %v269_v0  ;;  %v259_v1 = vld [vmem:[%s382_s5] sm:$0xff]   ;;  %253 = vmatprep.mubr.msk.bf16.mxu0 %vm270_vm0, %v269_v0  ;;  %184 = vst [vmem:[%s383_s7] sm:$0x1] %v269_v0  ;;  %185 = vst [vmem:[%s384_s8] sm:$0x1] %v269_v0  ;;  %v260_v2 = vld [vmem:[%s382_s5 + $0x8] sm:$0xff]  }
   0x2   :  { %238 = vmatpush3.bf16.msra.mxu0 %v259_v1  ;;  %v261_v3 = vld [vmem:[%s382_s5 + $0x10] sm:$0xff]   ;;  %v27_v4 = vld [vmem:[%s385_s1] sm:$0x1]  ;;  %v262_v8 = vld [vmem:[%s382_s5 + $0x18] sm:$0xff]   ;;  %v45_v17 = vshrl.u32 %v44_v15, 7 }
   0x3   :  { %239 = vmatprep.subr.bf16.mxu0 %v269_v0  ;;  %v29_v5 = vld [vmem:[%s386_s2] sm:$0x1]  ;;  %v28_v6 = vmul.f32 0.125, %v27_v4  ;;  %v264_v14 = vld [vmem:[%s382_s5 + $0x28] sm:$0xff]   ;;  %v265_v16 = vld [vmem:[%s382_s5 + $0x30] sm:$0xff]  }
   0x4   :  { %v30_v7 = vmul.f32 0.125, %v29_v5  ;;  %v263_v11 = vld [vmem:[%s382_s5 + $0x20] sm:$0xff]   ;;  %v266_v18 = vld [vmem:[%s382_s5 + $0x38] sm:$0xff]   ;;  %v46_v20 = vsub.s32 0, %v45_v17  ;;  %v42_v25 = vld [vmem:[%s388_s0 + $0x8] sm:$0xff] }
   0x5   :  { %v31_v9 = vmul.f32 %v28_v6, %v28_v6  ;;  %v34_v19 = vld [vmem:[%s387_s3] sm:$0x1] }
   0x6   :  { %240 = vmatpush3.bf16.msra.mxu0 %v260_v2  ;;  %v38_v23 = vld [vmem:[%s389_s4] sm:$0x1] }
   0x7   :  { %241 = vmatprep.subr.bf16.mxu0 %v269_v0  ;;  %v32_v10 = vsub.f32 %v30_v7, %v31_v9  ;;  %v41_v24 = vld [vmem:[%s388_s0] sm:$0xff] }
   0x8   :  { %v186_v51 = vld [vmem:[%s383_s7] sm:$0x1] }
   0x9   :  { %v33_v12 = vmax.f32 %v32_v10, 0.0  ;;  %v196_v54 = vld [vmem:[%s384_s8] sm:$0x1] }
   0xa   :  { %242 = vmatpush3.bf16.msra.mxu0 %v261_v3 }
   0xb   :  { %243 = vmatprep.subr.bf16.mxu0 %v269_v0  ;;  %v35_v13 = vadd.f32 1e-05, %v33_v12 }
   0xd   :  { %267 = vrsqrt.f32 %v35_v13 }
   0xe   :  { %244 = vmatpush3.bf16.msra.mxu0 %v262_v8 }
   0xf   :  { %245 = vmatprep.subr.bf16.mxu0 %v269_v0 }
  0x12   :  { %246 = vmatpush3.bf16.msra.mxu0 %v263_v11 }
  0x13   :  { %247 = vmatprep.subr.bf16.mxu0 %v269_v0 }
  0x16   :  { %248 = vmatpush3.bf16.msra.mxu0 %v264_v14 }
  0x17   :  { %249 = vmatprep.subr.bf16.mxu0 %v269_v0  ;;  %v268_v21 = vpop.eup %267 }
  0x18   :  { %v37_v22 = vmul.f32 %v268_v21, %v34_v19 }
  0x1a   :  { %250 = vmatpush3.bf16.msra.mxu0 %v265_v16  ;;  %v39_v26 = vmul.f32 %v37_v22, %v28_v6  ;;  %v47_v27 = vrot.slane %v37_v22, %v46_v20 }
  0x1b   :  { %251 = vmatprep.subr.bf16.mxu0 %v269_v0 }
  0x1c   :  { %v40_v28 = vsub.f32 %v38_v23, %v39_v26  ;;  %v49_v29 = vmul.f32 %v47_v27, %v41_v24  ;;  %v50_v30 = vmul.f32 %v47_v27, %v42_v25 }
  0x1e   :  { %252 = vmatpush3.bf16.msra.mxu0 %v266_v18  ;;  %v55_v31 = vrot.slane %v40_v28, %v46_v20 }
  0x20   :  { %v57_v32 = vadd.f32 %v55_v31, %v49_v29  ;;  %v58_v33 = vadd.f32 %v55_v31, %v50_v30 }
  0x22   :  { %v59_v34 = vmax.f32 %v57_v32, 0.0  ;;  %v60_v35 = vmax.f32 %v58_v33, 0.0 }
  0x24   :  { %v61_v36 = vpack.c.bf16 %v60_v35, %v59_v34 }
  0x26   :  { %254 = vmatmul.mubr.bf16.vlgmr.msra.gmra.mrb[0].mxu0 %v61_v36 }
  0xf9   :  { %v160_v37 = vpop.f32.mrb[0].mxu0 }
  0xfa   :  { %v188_v38 = vrot.slane %v160_v37, 4  ;;  %v197_v39 = vmul.f32 %v160_v37, %v160_v37  ;;  %v255_v40 = vpop.f32.mrb[1].mxu0  ;;  %167 = vst [vmem:[%s390_s6] sm:$0xff] %v160_v37 }
  0xfb   :  { %v163_v41 = vpop.f32.mrb[2].mxu0 }
  0xfc   :  { %v189_v42 = vadd.f32 %v188_v38, %v160_v37  ;;  %v200_v43 = vrot.slane %v197_v39, 4  ;;  %168 = vst [vmem:[%s390_s6 + $0x8] sm:$0xff] %v163_v41  ;;  %v256_v44 = vpop.f32.mrb[3].mxu0 }
  0xfe   :  { %v190_v45 = vrot.slane %v189_v42, 2  ;;  %v201_v46 = vadd.f32 %v200_v43, %v197_v39 }
 0x100   :  { %v191_v47 = vadd.f32 %v190_v45, %v189_v42  ;;  %v202_v48 = vrot.slane %v201_v46, 2 }
 0x102   :  { %v192_v49 = vrot.slane %v191_v47, 1  ;;  %v203_v50 = vadd.f32 %v202_v48, %v201_v46 }
 0x104   :  { %v193_v52 = vadd.f32 %v192_v49, %v191_v47  ;;  %v204_v53 = vrot.slane %v203_v50, 1 }
 0x106   :  { %v194_v55 = vadd.f32 %v193_v52, %v186_v51  ;;  %v205_v56 = vadd.f32 %v204_v53, %v203_v50 }
 0x108   :  { %195 = vst [vmem:[%s383_s7] sm:$0x1] %v194_v55  ;;  %v206_v57 = vadd.f32 %v205_v56, %v196_v54 }
 0x10a   :  { %207 = vst [vmem:[%s384_s8] sm:$0x1] %v206_v57 }

// kernel: _label_predictor_impl.3
= control target key start
LH: loop header
LB: loop body
LE: loop exit
PB: predicated region body
PF: predicated region fallthrough
CT: control target
= control target key end

     0   :  { %10 = vsyncpa [#allocation3], 0  ;;  %s591_s15 = smov [#allocation2]   ;;  %s668_s0 = inlined_call_operand.vmem [shape: bf16[16,512], index: 0, kind: input, shape index: {}]   ;;  %s669_s1 = inlined_call_operand.hbm [shape: bf16[512,128], index: 1, kind: input, shape index: {}]   ;;  %s670_s2 = inlined_call_operand.vmem [shape: f32[16,128], index: 2, kind: output, shape index: {0}]   ;;  %s671_s3 = inlined_call_operand.vmem [shape: f32[1,128], index: 3, kind: output, shape index: {1}]   ;;  %s672_s4 = inlined_call_operand.vmem [shape: f32[1,128], index: 4, kind: output, shape index: {2}]  }
   0x1   :  { %s18_s16 = sshll.u32 %s591_s15, 4  ;;  %s567_s19 = scalar_lea.hbm %s669_s1, 4096  ;;  %s19_s16 = int_to_ptr.vmem [resolvable:$true] %s18_s16 }
   0x2   :  { %p568_p0 = scmp.ne.s32.totalorder %s669_s1, %s567_s19  ;;  %p571_p1 = scmp.lt.u32.totalorder %s567_s19, %s669_s1 }
   0x4   :  { %p573_p2 = pnand %p571_p1, %p568_p0 }
   0x6   :  { %576 = shalt.err (!%p573_p2)
}
   0x7   :  { %s577_s24 = scalar_lea.vmem %s19_s16, 4096  ;;  %p582_p4 = scmp.lt.s32.totalorder %s19_s16, %s19_s16 }
   0x8   :  { %p578_p3 = scmp.ne.s32.totalorder %s19_s16, %s577_s24  ;;  %p583_p5 = scmp.lt.s32.totalorder %s577_s24, %s577_s24 }
   0xa   :  { %p584_p6 = por %p583_p5, %p582_p4 }
   0xc   :  { %p585_p7 = pnand %p584_p6, %p578_p3 }
   0xe   :  { %588 = shalt.err (!%p585_p7)
}
   0xf   :  { %s592_s25 = smov 64   ;;  %s593_s26 = smov 4  }
  0x10   :  { %24 = dma.hbm_to_vmem [thread:$0]  %s669_s1, 4096, %s19_s16, [#allocation3], %s592_s25, %s592_s25, %s593_s26  }
  0x11   :  { %589 = dma.done.wait [#allocation3], 4096  }
  0x12   :  { %590 = vsyncadd [#allocation3], 4294963200  ;;  %v529_v0 = vld [vmem:[#allocation2 + $0x40] sm:$0xff]   ;;  %v533_v4 = vld [vmem:[#allocation2 + $0x48] sm:$0xff]   ;;  %v594_v36 = vmov 0.0  }
  0x13   :  { %v530_v1 = vld [vmem:[#allocation2 + $0xc0] sm:$0xff]   ;;  %481 = vmatprep.subr.bf16.mxu0 %v529_v0  ;;  %v534_v5 = vld [vmem:[#allocation2 + $0xc8] sm:$0xff]   ;;  %v537_v8 = vld [vmem:[#allocation2 + $0x50] sm:$0xff]   ;;  %408 = vst [vmem:[%s671_s3] sm:$0x1] %v594_v36 }
  0x14   :  { %v531_v2 = vld [vmem:[#allocation2] sm:$0xff]   ;;  %503 = vmatprep.subr.bf16.mxu1 %v530_v1  ;;  %v535_v6 = vld [vmem:[#allocation2 + $0x8] sm:$0xff]   ;;  %v538_v9 = vld [vmem:[#allocation2 + $0xd0] sm:$0xff]   ;;  %409 = vst [vmem:[%s672_s4] sm:$0x1] %v594_v36 }
  0x15   :  { %v532_v3 = vld [vmem:[#allocation2 + $0x80] sm:$0xff]   ;;  %482 = vmatpush3.bf16.msra.mxu0 %v531_v2  ;;  %v536_v7 = vld [vmem:[#allocation2 + $0x88] sm:$0xff]   ;;  %v539_v10 = vld [vmem:[#allocation2 + $0x10] sm:$0xff]  }
  0x16   :  { %504 = vmatpush3.bf16.msra.mxu1 %v532_v3  ;;  %483 = vmatprep.subr.bf16.mxu0 %v533_v4  ;;  %v540_v11 = vld [vmem:[#allocation2 + $0x90] sm:$0xff]   ;;  %v541_v12 = vld [vmem:[#allocation2 + $0x58] sm:$0xff]   ;;  %v545_v16 = vld [vmem:[#allocation2 + $0x60] sm:$0xff]  }
  0x17   :  { %505 = vmatprep.subr.bf16.mxu1 %v534_v5  ;;  %v542_v13 = vld [vmem:[#allocation2 + $0xd8] sm:$0xff]   ;;  %v546_v17 = vld [vmem:[#allocation2 + $0xe0] sm:$0xff]   ;;  %v549_v20 = vld [vmem:[#allocation2 + $0x68] sm:$0xff]  }
  0x18   :  { %v543_v14 = vld [vmem:[#allocation2 + $0x18] sm:$0xff]   ;;  %v547_v18 = vld [vmem:[#allocation2 + $0x20] sm:$0xff]   ;;  %v550_v21 = vld [vmem:[#allocation2 + $0xe8] sm:$0xff]  }
  0x19   :  { %484 = vmatpush3.bf16.msra.mxu0 %v535_v6  ;;  %v544_v15 = vld [vmem:[#allocation2 + $0x98] sm:$0xff]   ;;  %v548_v19 = vld [vmem:[#allocation2 + $0xa0] sm:$0xff]   ;;  %v551_v22 = vld [vmem:[#allocation2 + $0x28] sm:$0xff]  }
  0x1a   :  { %506 = vmatpush3.bf16.msra.mxu1 %v536_v7  ;;  %485 = vmatprep.subr.bf16.mxu0 %v537_v8  ;;  %v552_v23 = vld [vmem:[#allocation2 + $0xa8] sm:$0xff]   ;;  %v553_v24 = vld [vmem:[#allocation2 + $0x70] sm:$0xff]   ;;  %v557_v28 = vld [vmem:[#allocation2 + $0x78] sm:$0xff]  }
  0x1b   :  { %507 = vmatprep.subr.bf16.mxu1 %v538_v9  ;;  %v554_v25 = vld [vmem:[#allocation2 + $0xf0] sm:$0xff]   ;;  %v558_v29 = vld [vmem:[#allocation2 + $0xf8] sm:$0xff]   ;;  %v410_v61 = vld [vmem:[%s671_s3] sm:$0x1] }
  0x1c   :  { %v555_v26 = vld [vmem:[#allocation2 + $0x30] sm:$0xff]   ;;  %v559_v30 = vld [vmem:[#allocation2 + $0x38] sm:$0xff]   ;;  %v420_v0 = vld [vmem:[%s672_s4] sm:$0x1] }
  0x1d   :  { %486 = vmatpush3.bf16.msra.mxu0 %v539_v10  ;;  %v556_v27 = vld [vmem:[#allocation2 + $0xb0] sm:$0xff]   ;;  %v560_v31 = vld [vmem:[#allocation2 + $0xb8] sm:$0xff]  }
  0x1e   :  { %508 = vmatpush3.bf16.msra.mxu1 %v540_v11  ;;  %487 = vmatprep.subr.bf16.mxu0 %v541_v12  ;;  %v561_v32 = vld [vmem:[%s668_s0] ss:$16 sps:$4 sm:$0xff]   ;;  %v563_v33 = vld [vmem:[%s668_s0 + $0x4] ss:$16 sps:$4 sm:$0xff]   ;;  %v564_v34 = vld [vmem:[%s668_s0 + $0x8] ss:$16 sps:$4 sm:$0xff]  }
  0x1f   :  { %509 = vmatprep.subr.bf16.mxu1 %v542_v13  ;;  %v566_v35 = vld [vmem:[%s668_s0 + $0xc] ss:$16 sps:$4 sm:$0xff]   ;;  %341 = vmatprep.mubr.bf16.mxu0 %v563_v33 }
  0x20   :  { %382 = vmatprep.mubr.bf16.mxu1 %v566_v35 }
  0x21   :  { %488 = vmatpush3.bf16.msra.mxu0 %v543_v14 }
  0x22   :  { %510 = vmatpush3.bf16.msra.mxu1 %v544_v15  ;;  %489 = vmatprep.subr.bf16.mxu0 %v545_v16 }
  0x23   :  { %511 = vmatprep.subr.bf16.mxu1 %v546_v17 }
  0x25   :  { %490 = vmatpush3.bf16.msra.mxu0 %v547_v18 }
  0x26   :  { %512 = vmatpush3.bf16.msra.mxu1 %v548_v19  ;;  %491 = vmatprep.subr.bf16.mxu0 %v549_v20 }
  0x27   :  { %513 = vmatprep.subr.bf16.mxu1 %v550_v21 }
  0x29   :  { %492 = vmatpush3.bf16.msra.mxu0 %v551_v22 }
  0x2a   :  { %514 = vmatpush3.bf16.msra.mxu1 %v552_v23  ;;  %493 = vmatprep.subr.bf16.mxu0 %v553_v24 }
  0x2b   :  { %515 = vmatprep.subr.bf16.mxu1 %v554_v25 }
  0x2d   :  { %494 = vmatpush3.bf16.msra.mxu0 %v555_v26 }
  0x2e   :  { %516 = vmatpush3.bf16.msra.mxu1 %v556_v27  ;;  %495 = vmatprep.subr.bf16.mxu0 %v557_v28 }
  0x2f   :  { %517 = vmatprep.subr.bf16.mxu1 %v558_v29 }
  0x31   :  { %496 = vmatpush3.bf16.msra.mxu0 %v559_v30 }
  0x32   :  { %518 = vmatpush3.bf16.msra.mxu1 %v560_v31 }
  0x34   :  { %342 = vmatmul.mubr.bf16.vlgmr.msra.gmra.mrb[0].mxu0 %v561_v32 }
  0x35   :  { %383 = vmatmul.mubr.bf16.vlgmr.msra.gmra.mrb[0].mxu1 %v564_v34 }
 0x107   :  { %v497_v37 = vpop.f32.mrb[0].mxu0 }
 0x108   :  { %v519_v38 = vpop.f32.mrb[0].mxu1  ;;  %v498_v39 = vpop.f32.mrb[1].mxu0 }
 0x109   :  { %v499_v40 = vadd.f32 %v498_v39, %v497_v37  ;;  %v520_v41 = vpop.f32.mrb[1].mxu1  ;;  %v500_v42 = vpop.f32.mrb[2].mxu0 }
 0x10a   :  { %v521_v43 = vadd.f32 %v520_v41, %v519_v38  ;;  %v522_v44 = vpop.f32.mrb[2].mxu1  ;;  %v501_v45 = vpop.f32.mrb[3].mxu0 }
 0x10b   :  { %v502_v46 = vadd.f32 %v501_v45, %v500_v42  ;;  %v523_v47 = vpop.f32.mrb[3].mxu1 }
 0x10c   :  { %v385_v48 = vadd.f32 %v521_v43, %v499_v40  ;;  %v524_v49 = vadd.f32 %v523_v47, %v522_v44 }
 0x10e   :  { %391 = vst [vmem:[%s670_s2] sm:$0xff] %v385_v48  ;;  %v412_v50 = vrot.slane %v385_v48, 4  ;;  %v421_v51 = vmul.f32 %v385_v48, %v385_v48  ;;  %v388_v52 = vadd.f32 %v524_v49, %v502_v46 }
 0x110   :  { %v413_v53 = vadd.f32 %v412_v50, %v385_v48  ;;  %v424_v54 = vrot.slane %v421_v51, 4  ;;  %392 = vst [vmem:[%s670_s2 + $0x8] sm:$0xff] %v388_v52 }
 0x112   :  { %v414_v55 = vrot.slane %v413_v53, 2  ;;  %v425_v56 = vadd.f32 %v424_v54, %v421_v51 }
 0x114   :  { %v415_v57 = vadd.f32 %v414_v55, %v413_v53  ;;  %v426_v58 = vrot.slane %v425_v56, 2 }
 0x116   :  { %v416_v59 = vrot.slane %v415_v57, 1  ;;  %v427_v60 = vadd.f32 %v426_v58, %v425_v56 }
 0x118   :  { %v417_v62 = vadd.f32 %v416_v59, %v415_v57  ;;  %v428_v63 = vrot.slane %v427_v60, 1 }
 0x11a   :  { %v418_v1 = vadd.f32 %v417_v62, %v410_v61  ;;  %v429_v2 = vadd.f32 %v428_v63, %v427_v60 }
 0x11c   :  { %419 = vst [vmem:[%s671_s3] sm:$0x1] %v418_v1  ;;  %v430_v3 = vadd.f32 %v429_v2, %v420_v0 }
 0x11e   :  { %431 = vst [vmem:[%s672_s4] sm:$0x1] %v430_v3 }
 0x11f   :  { %444 = vsyncpa [#allocation3], 1 }

// kernel: _label_predictor_impl.5
= control target key start
LH: loop header
LB: loop body
LE: loop exit
PB: predicated region body
PF: predicated region fallthrough
CT: control target
= control target key end

     0   :  { %v230_v0 = vmov 0.0   ;;  %vm231_vm0 = vmmov 0   ;;  %v44_v15 = vlaneseq  ;;  %s323_s5 = inlined_call_operand.vmem [shape: bf16[128,128], index: 5, kind: input, shape index: {}]   ;;  %s324_s1 = inlined_call_operand.vmem [shape: f32[1,128], index: 1, kind: input, shape index: {}]   ;;  %s325_s2 = inlined_call_operand.vmem [shape: f32[1,128], index: 2, kind: input, shape index: {}]   ;;  %s326_s3 = inlined_call_operand.vmem [shape: f32[1,128], index: 3, kind: input, shape index: {}]   ;;  %s327_s0 = inlined_call_operand.vmem [shape: f32[16,128], index: 0, kind: input, shape index: {}]   ;;  %s328_s4 = inlined_call_operand.vmem [shape: f32[1,128], index: 4, kind: input, shape index: {}]   ;;  %s329_s6 = inlined_call_operand.vmem [shape: f32[1,128], index: 6, kind: input, shape index: {}]   ;;  %s330_s7 = inlined_call_operand.vmem [shape: f32[16,128], index: 7, kind: output, shape index: {}]  }
   0x1   :  { %198 = vmatprep.subr.bf16.mxu0 %v230_v0  ;;  %v220_v1 = vld [vmem:[%s323_s5] sm:$0xff]   ;;  %214 = vmatprep.mubr.msk.bf16.mxu0 %vm231_vm0, %v230_v0  ;;  %v221_v2 = vld [vmem:[%s323_s5 + $0x8] sm:$0xff]   ;;  %v222_v3 = vld [vmem:[%s323_s5 + $0x10] sm:$0xff]  }
   0x2   :  { %199 = vmatpush3.bf16.msra.mxu0 %v220_v1  ;;  %v27_v4 = vld [vmem:[%s324_s1] sm:$0x1]  ;;  %v223_v8 = vld [vmem:[%s323_s5 + $0x18] sm:$0xff]   ;;  %v225_v14 = vld [vmem:[%s323_s5 + $0x28] sm:$0xff]   ;;  %v45_v17 = vshrl.u32 %v44_v15, 7 }
   0x3   :  { %200 = vmatprep.subr.bf16.mxu0 %v230_v0  ;;  %v29_v5 = vld [vmem:[%s325_s2] sm:$0x1]  ;;  %v28_v6 = vmul.f32 0.125, %v27_v4  ;;  %v226_v16 = vld [vmem:[%s323_s5 + $0x30] sm:$0xff]   ;;  %v227_v18 = vld [vmem:[%s323_s5 + $0x38] sm:$0xff]  }
   0x4   :  { %v30_v7 = vmul.f32 0.125, %v29_v5  ;;  %v224_v11 = vld [vmem:[%s323_s5 + $0x20] sm:$0xff]   ;;  %v46_v20 = vsub.s32 0, %v45_v17  ;;  %v42_v25 = vld [vmem:[%s327_s0 + $0x8] sm:$0xff] }
   0x5   :  { %v31_v9 = vmul.f32 %v28_v6, %v28_v6  ;;  %v34_v19 = vld [vmem:[%s326_s3] sm:$0x1] }
   0x6   :  { %201 = vmatpush3.bf16.msra.mxu0 %v221_v2  ;;  %v38_v23 = vld [vmem:[%s328_s4] sm:$0x1] }
   0x7   :  { %202 = vmatprep.subr.bf16.mxu0 %v230_v0  ;;  %v32_v10 = vsub.f32 %v30_v7, %v31_v9  ;;  %v41_v24 = vld [vmem:[%s327_s0] sm:$0xff] }
   0x8   :  { %v180_v37 = vld [vmem:[%s329_s6] ss:$0 sm:$0xff] }
   0x9   :  { %v33_v12 = vmax.f32 %v32_v10, 0.0 }
   0xa   :  { %203 = vmatpush3.bf16.msra.mxu0 %v222_v3 }
   0xb   :  { %204 = vmatprep.subr.bf16.mxu0 %v230_v0  ;;  %v35_v13 = vadd.f32 1e-05, %v33_v12 }
   0xd   :  { %228 = vrsqrt.f32 %v35_v13 }
   0xe   :  { %205 = vmatpush3.bf16.msra.mxu0 %v223_v8 }
   0xf   :  { %206 = vmatprep.subr.bf16.mxu0 %v230_v0 }
  0x12   :  { %207 = vmatpush3.bf16.msra.mxu0 %v224_v11 }
  0x13   :  { %208 = vmatprep.subr.bf16.mxu0 %v230_v0 }
  0x16   :  { %209 = vmatpush3.bf16.msra.mxu0 %v225_v14 }
  0x17   :  { %210 = vmatprep.subr.bf16.mxu0 %v230_v0  ;;  %v229_v21 = vpop.eup %228 }
  0x18   :  { %v37_v22 = vmul.f32 %v229_v21, %v34_v19 }
  0x1a   :  { %211 = vmatpush3.bf16.msra.mxu0 %v226_v16  ;;  %v39_v26 = vmul.f32 %v37_v22, %v28_v6  ;;  %v47_v27 = vrot.slane %v37_v22, %v46_v20 }
  0x1b   :  { %212 = vmatprep.subr.bf16.mxu0 %v230_v0 }
  0x1c   :  { %v40_v28 = vsub.f32 %v38_v23, %v39_v26  ;;  %v49_v29 = vmul.f32 %v47_v27, %v41_v24  ;;  %v50_v30 = vmul.f32 %v47_v27, %v42_v25 }
  0x1e   :  { %213 = vmatpush3.bf16.msra.mxu0 %v227_v18  ;;  %v55_v31 = vrot.slane %v40_v28, %v46_v20 }
  0x20   :  { %v57_v32 = vadd.f32 %v55_v31, %v49_v29  ;;  %v58_v33 = vadd.f32 %v55_v31, %v50_v30 }
  0x22   :  { %v59_v34 = vmax.f32 %v57_v32, 0.0  ;;  %v60_v35 = vmax.f32 %v58_v33, 0.0 }
  0x24   :  { %v61_v36 = vpack.c.bf16 %v60_v35, %v59_v34 }
  0x26   :  { %215 = vmatmul.mubr.bf16.vlgmr.msra.gmra.mrb[0].mxu0 %v61_v36 }
  0xf9   :  { %v167_v38 = vpop.f32.mrb[0].mxu0 }
  0xfa   :  { %v168_v39 = vadd.f32 %v180_v37, %v167_v38  ;;  %v216_v40 = vpop.f32.mrb[1].mxu0 }
  0xfb   :  { %v170_v41 = vpop.f32.mrb[2].mxu0 }
  0xfc   :  { %174 = vst [vmem:[%s330_s7] sm:$0xff] %v168_v39  ;;  %v171_v42 = vadd.f32 %v180_v37, %v170_v41  ;;  %v217_v43 = vpop.f32.mrb[3].mxu0 }
  0xfe   :  { %175 = vst [vmem:[%s330_s7 + $0x8] sm:$0xff] %v171_v42 }

</bundles_post_ra>
